<compile_context>
chip_gen: v7x
topology: tpu7x:2x2x1
jax: 0.10.0
libtpu: 0.0.40
codegen_flags: <defaults>
</compile_context>

<pallas_src>
import jax
import jax.numpy as jnp
from jax.experimental import pallas as pl
from jax.experimental.pallas import tpu as pltpu


# ----------------------------------------------------------------------------
# Kernels
# ----------------------------------------------------------------------------

def _twinned_q_fused_kernel(z_ref, a_ref, w1z_ref, w1a_ref, b1_ref,
                            w2_ref, b2_ref, w3_ref, b3_ref, q_ref):
    """Single-step kernel: all Q heads computed in one invocation.

    VMEM shapes:
      z_ref   : (B, Z)              f32
      a_ref   : (B, A)              f32
      w1z_ref : (Z, nh*H1)          bf16  (both heads' layer-1 fused on out dim)
      w1a_ref : (A, nh*H1)          f32
      b1_ref  : (1, nh*H1)          f32
      w2_ref  : (nh, H1, H2)        bf16
      b2_ref  : (nh, 1, H2)         f32
      w3_ref  : (nh, H2, 1)         bf16
      b3_ref  : (nh, 1, 1)          f32
      q_ref   : (nh, B, 1)          f32
    """
    num_heads = w2_ref.shape[0]
    h1_dim = w2_ref.shape[1]

    z = z_ref[...].astype(jnp.bfloat16)
    a = a_ref[...]

    # Fused layer 1 for all heads: one MXU pass over the shared input.
    h1 = jnp.dot(z, w1z_ref[...], preferred_element_type=jnp.float32)
    h1 = h1 + jnp.dot(a, w1a_ref[...], preferred_element_type=jnp.float32)
    h1 = jnp.maximum(h1 + b1_ref[...], 0.0).astype(jnp.bfloat16)  # (B, nh*H1)

    for i in range(num_heads):  # static unroll (num_heads is tiny)
        h1_i = h1[:, i * h1_dim:(i + 1) * h1_dim]
        h2 = jnp.dot(h1_i, w2_ref[i], preferred_element_type=jnp.float32)
        h2 = jnp.maximum(h2 + b2_ref[i], 0.0).astype(jnp.bfloat16)
        q = jnp.dot(h2, w3_ref[i], preferred_element_type=jnp.float32) + b3_ref[i]
        q_ref[i] = q.astype(q_ref.dtype)


def _twinned_q_head_kernel(z_ref, a_ref, w1z_ref, w1a_ref, b1_ref,
                           w2_ref, b2_ref, w3_ref, b3_ref, q_ref):
    """Per-head kernel: grid=(num_heads,), one independent Q head per step.

    Used on multi-TensorCore chips (v7x); the "parallel" grid axis shards the
    heads across the TensorCores.
    """
    z = z_ref[...].astype(jnp.bfloat16)
    a = a_ref[...]
    h1 = jnp.dot(z, w1z_ref[0], preferred_element_type=jnp.float32)
    h1 = h1 + jnp.dot(a, w1a_ref[0], preferred_element_type=jnp.float32)
    h1 = jnp.maximum(h1 + b1_ref[0], 0.0).astype(jnp.bfloat16)
    h2 = jnp.dot(h1, w2_ref[0], preferred_element_type=jnp.float32)
    h2 = jnp.maximum(h2 + b2_ref[0], 0.0).astype(jnp.bfloat16)
    q = jnp.dot(h2, w3_ref[0], preferred_element_type=jnp.float32) + b3_ref[0]
    q_ref[0] = q.astype(q_ref.dtype)


# ----------------------------------------------------------------------------
# Wrappers
# ----------------------------------------------------------------------------

def _total_bytes(*arrays):
    return int(sum(a.size * a.dtype.itemsize for a in arrays))


def _forward_fused(z, action, p):
    """Single pallas_call, no grid (best for single-TensorCore chips)."""
    w1z, w1a, b1 = p["w1z"], p["w1a"], p["b1"]
    w2, b2, w3, b3 = p["w2"], p["b2"], p["w3"], p["b3"]
    batch = z.shape[0]
    num_heads, h1_dim, h2_dim = w2.shape
    out_dim = w3.shape[-1]
    z_dim, a_dim = z.shape[1], action.shape[1]

    def full_spec(shape):
        nd = len(shape)
        return pl.BlockSpec(tuple(shape), lambda: (0,) * nd)

    inputs = (z, action, w1z, w1a, b1, w2, b2, w3, b3)
    out_bytes = num_heads * batch * out_dim * 4
    in_bytes = _total_bytes(*inputs)
    # Kernel footprint is ~0.6 MiB; a few MiB is ample and leaves scoped VMEM
    # for neighboring fusions (important on v7x's 64 MiB physical VMEM).
    vmem_limit = max(4 * 1024 * 1024, 2 * (in_bytes + out_bytes))

    flops = (2 * batch * (z_dim + a_dim) * num_heads * h1_dim
             + num_heads * 2 * batch * (h1_dim * h2_dim + h2_dim * out_dim))

    q = pl.pallas_call(
        _twinned_q_fused_kernel,
        out_shape=jax.ShapeDtypeStruct((num_heads, batch, out_dim), jnp.float32),
        in_specs=[full_spec(arr.shape) for arr in inputs],
        out_specs=full_spec((num_heads, batch, out_dim)),
        compiler_params=pltpu.CompilerParams(vmem_limit_bytes=vmem_limit),
        cost_estimate=pl.CostEstimate(
            flops=flops, transcendentals=0,
            bytes_accessed=in_bytes + out_bytes),
    )(*inputs)
    return q[0], q[1]


def _forward_per_head(z, action, p):
    """grid=(num_heads,) "parallel" over heads (for v7x's 2 TensorCores)."""
    w1z, w1a, b1 = p["w1z"], p["w1a"], p["b1"]
    w2, b2, w3, b3 = p["w2"], p["b2"], p["w3"], p["b3"]
    batch = z.shape[0]
    num_heads, h1_dim, h2_dim = w2.shape
    out_dim = w3.shape[-1]
    z_dim, a_dim = z.shape[1], action.shape[1]

    def head_spec(shape):
        nd = len(shape)
        return pl.BlockSpec((1,) + tuple(shape[1:]),
                            lambda h: (h,) + (0,) * (nd - 1))

    def shared_spec(shape):
        nd = len(shape)
        return pl.BlockSpec(tuple(shape), lambda h: (0,) * nd)

    inputs = (z, action, w1z, w1a, b1, w2, b2, w3, b3)
    out_shape = (num_heads, batch, out_dim)
    out_bytes = num_heads * batch * out_dim * 4
    in_bytes = _total_bytes(*inputs)
    per_step = (_total_bytes(z, action)
                + _total_bytes(w1z, w1a, b1, w2, b2, w3, b3) // num_heads
                + out_bytes // num_heads)
    vmem_limit = max(4 * 1024 * 1024, 3 * per_step)

    flops = num_heads * 2 * batch * ((z_dim + a_dim) * h1_dim
                                     + h1_dim * h2_dim + h2_dim * out_dim)

    q = pl.pallas_call(
        _twinned_q_head_kernel,
        out_shape=jax.ShapeDtypeStruct(out_shape, jnp.float32),
        grid_spec=pltpu.PrefetchScalarGridSpec(
            num_scalar_prefetch=0,
            grid=(num_heads,),
            in_specs=[shared_spec(z.shape), shared_spec(action.shape),
                      head_spec(w1z.shape), head_spec(w1a.shape),
                      head_spec(b1.shape),
                      head_spec(w2.shape), head_spec(b2.shape),
                      head_spec(w3.shape), head_spec(b3.shape)],
            out_specs=head_spec(out_shape)),
        compiler_params=pltpu.CompilerParams(
            dimension_semantics=("parallel",),
            vmem_limit_bytes=vmem_limit),
        cost_estimate=pl.CostEstimate(
            flops=flops, transcendentals=0,
            bytes_accessed=in_bytes + out_bytes),
    )(*inputs)
    return q[0], q[1]


def twinned_q_forward(z, action, prepped):
    """TwinnedQNetwork.forward: returns (Q1(z, a), Q2(z, a)), each (B, 1) f32."""
    if prepped["w1z"].ndim == 2:      # fused-layer-1 layout (single-TC chips)
        return _forward_fused(z, action, prepped)
    return _forward_per_head(z, action, prepped)


# ----------------------------------------------------------------------------
# One-time parameter preparation (hoisted out of the per-call path)
# ----------------------------------------------------------------------------

def prepare_params(params, z_dim, *, per_head_grid=False):
    """Convert f32 training params into the kernel-resident layout ONCE.

    params: w1 (nh, z_dim + act_dim, H1), b1 (nh, H1), w2 (nh, H1, H2),
            b2 (nh, H2), w3 (nh, H2, 1), b3 (nh, 1); w1 row order follows
            torch.cat([z, action], dim=1).
    """
    w1, b1 = params["w1"], params["b1"]
    w2, b2 = params["w2"], params["b2"]
    w3, b3 = params["w3"], params["b3"]
    num_heads, _, h1_dim = w1.shape
    h2_dim = w2.shape[-1]
    out_dim = w3.shape[-1]

    w1z = w1[:, :z_dim, :]     # (nh, Z, H1) — Z = 288 is already 16-aligned
    w1a = w1[:, z_dim:, :]     # (nh, A, H1) — tiny, kept f32

    if per_head_grid:
        p = dict(
            w1z=w1z.astype(jnp.bfloat16),
            w1a=w1a.astype(jnp.float32),
            b1=b1.reshape(num_heads, 1, h1_dim).astype(jnp.float32),
            w2=w2.astype(jnp.bfloat16),
            b2=b2.reshape(num_heads, 1, h2_dim).astype(jnp.float32),
            w3=w3.astype(jnp.bfloat16),
            b3=b3.reshape(num_heads, 1, out_dim).astype(jnp.float32),
        )
    else:
        # Fuse both heads' layer 1 along the output dim -> one matmul on shared x.
        w1z_cat = jnp.concatenate([w1z[i] for i in range(num_heads)], axis=-1)
        w1a_cat = jnp.concatenate([w1a[i] for i in range(num_heads)], axis=-1)
        b1_cat = jnp.concatenate([b1[i] for i in range(num_heads)], axis=-1)
        p = dict(
            w1z=w1z_cat.astype(jnp.bfloat16),                  # (Z, nh*H1)
            w1a=w1a_cat.astype(jnp.float32),                   # (A, nh*H1)
            b1=b1_cat.reshape(1, num_heads * h1_dim).astype(jnp.float32),
            w2=w2.astype(jnp.bfloat16),
            b2=b2.reshape(num_heads, 1, h2_dim).astype(jnp.float32),
            w3=w3.astype(jnp.bfloat16),
            b3=b3.reshape(num_heads, 1, out_dim).astype(jnp.float32),
        )
    # Materialize once so no per-call conversion work remains.
    return {k: jax.block_until_ready(v) for k, v in p.items()}


def _has_multiple_tensorcores():
    """True on chips with >1 TensorCore (v7x) -> split Q heads across cores."""
    try:
        kind = jax.devices()[0].device_kind.lower()
    except Exception:
        return False
    return "v7" in kind


# ----------------------------------------------------------------------------
# Synthetic init + pure-JAX reference
# ----------------------------------------------------------------------------

def init_params(key, in_dim, hidden_units, out_dim=1, num_nets=2):
    """Deterministic synthetic init (stand-in for initialize_weight)."""
    dims = (in_dim,) + tuple(hidden_units) + (out_dim,)
    params = {}
    for i in range(len(dims) - 1):
        key, kw = jax.random.split(key)
        scale = 1.0 / jnp.sqrt(jnp.float32(dims[i]))
        params[f"w{i + 1}"] = (
            jax.random.uniform(kw, (num_nets, dims[i], dims[i + 1]),
                               jnp.float32, -1.0, 1.0) * scale)
        params[f"b{i + 1}"] = jnp.zeros((num_nets, dims[i + 1]), jnp.float32)
    return params


def reference_forward(z, action, params):
    """Pure-JAX f32 reference of TwinnedQNetwork.forward."""
    x = jnp.concatenate([z, action], axis=1)
    outs = []
    for i in range(params["w1"].shape[0]):
        h = jnp.maximum(x @ params["w1"][i] + params["b1"][i], 0.0)
        h = jnp.maximum(h @ params["w2"][i] + params["b2"][i], 0.0)
        outs.append(h @ params["w3"][i] + params["b3"][i])
    return tuple(outs)


# ----------------------------------------------------------------------------
# Main
# ----------------------------------------------------------------------------

if __name__ == "__main__":
    # Module hyper-parameters (consistent with the PyTorch __init__).
    action_dim = 4
    z1_dim, z2_dim = 256, 32
    hidden_units = (256, 256)
    z_dim = z1_dim + z2_dim                  # 288
    in_dim = action_dim + z_dim              # 292
    batch = 2

    key = jax.random.PRNGKey(0)
    key, kz, ka = jax.random.split(key, 3)
    z = jax.random.normal(kz, (batch, z_dim), jnp.float32)
    action = jax.random.normal(ka, (batch, action_dim), jnp.float32)
    params = init_params(key, in_dim, hidden_units)

    # One-time prep: bf16 weights, layer-1 fusion, bias reshapes (hoisted out
    # of the per-call path). Per-head grid layout only on multi-TC chips (v7x).
    prepped = prepare_params(params, z_dim,
                             per_head_grid=_has_multiple_tensorcores())

    fwd = jax.jit(twinned_q_forward)
    q1, q2 = fwd(z, action, prepped)
    q1 = jax.block_until_ready(q1)
    q2 = jax.block_until_ready(q2)

    r1, r2 = reference_forward(z, action, params)
    assert q1.shape == (batch, 1) and q2.shape == (batch, 1)
    # bf16 weights/activations with f32 accumulation -> relaxed tolerance.
    assert jnp.allclose(q1, r1, atol=2e-2, rtol=2e-2), "net1 mismatch vs JAX reference"
    assert jnp.allclose(q2, r2, atol=2e-2, rtol=2e-2), "net2 mismatch vs JAX reference"

    print("KERNEL_OK")
</pallas_src>

<mosaic_0001>
module attributes {stable_mosaic.version = 11 : i64} {
  func.func @_twinned_q_fused_kernel(%arg0: memref<2x288xf32, #tpu.memory_space<vmem>>, %arg1: memref<2x4xf32, #tpu.memory_space<vmem>>, %arg2: memref<288x512xbf16, #tpu.memory_space<vmem>>, %arg3: memref<4x512xf32, #tpu.memory_space<vmem>>, %arg4: memref<1x512xf32, #tpu.memory_space<vmem>>, %arg5: memref<2x256x256xbf16, #tpu.memory_space<vmem>>, %arg6: memref<2x1x256xf32, #tpu.memory_space<vmem>>, %arg7: memref<2x256x1xbf16, #tpu.memory_space<vmem>>, %arg8: memref<2x1x1xf32, #tpu.memory_space<vmem>>, %arg9: memref<2x2x1xf32, #tpu.memory_space<vmem>>) attributes {dimension_semantics = [], scalar_prefetch = 0 : i64, scratch_operands = 0 : i64, tpu.core_type = #tpu.core_type<tc>} {
    %c0 = arith.constant 0 : index
    %c0_0 = arith.constant 0 : index
    %0 = vector.load %arg0[%c0, %c0_0] : memref<2x288xf32, #tpu.memory_space<vmem>>, vector<2x288xf32>
    %1 = arith.truncf %0 : vector<2x288xf32> to vector<2x288xbf16>
    %c0_1 = arith.constant 0 : index
    %c0_2 = arith.constant 0 : index
    %2 = vector.load %arg1[%c0_1, %c0_2] : memref<2x4xf32, #tpu.memory_space<vmem>>, vector<2x4xf32>
    %c0_3 = arith.constant 0 : index
    %c0_4 = arith.constant 0 : index
    %3 = vector.load %arg2[%c0_3, %c0_4] : memref<288x512xbf16, #tpu.memory_space<vmem>>, vector<288x512xbf16>
    %cst = arith.constant dense<0.000000e+00> : vector<2x512xf32>
    %4 = tpu.matmul %1, %3, %cst {dimension_numbers = #tpu.dot_dimension_numbers<[1], [0], [0], [1], [0, 0, 1, 1], [], []>} : vector<2x288xbf16>, vector<288x512xbf16>, vector<2x512xf32> -> vector<2x512xf32>
    %c0_5 = arith.constant 0 : index
    %c0_6 = arith.constant 0 : index
    %5 = vector.load %arg3[%c0_5, %c0_6] : memref<4x512xf32, #tpu.memory_space<vmem>>, vector<4x512xf32>
    %cst_7 = arith.constant dense<0.000000e+00> : vector<2x512xf32>
    %6 = tpu.matmul %2, %5, %cst_7 {dimension_numbers = #tpu.dot_dimension_numbers<[1], [0], [0], [1], [0, 0, 1, 1], [], []>} : vector<2x4xf32>, vector<4x512xf32>, vector<2x512xf32> -> vector<2x512xf32>
    %7 = arith.addf %4, %6 : vector<2x512xf32>
    %c0_8 = arith.constant 0 : index
    %c0_9 = arith.constant 0 : index
    %8 = vector.load %arg4[%c0_8, %c0_9] : memref<1x512xf32, #tpu.memory_space<vmem>>, vector<1x512xf32>
    %9 = vector.broadcast %8 : vector<1x512xf32> to vector<2x512xf32>
    %10 = arith.addf %7, %9 : vector<2x512xf32>
    %cst_10 = arith.constant 0.000000e+00 : f32
    %11 = vector.broadcast %cst_10 : f32 to vector<2x512xf32>
    %12 = arith.maximumf %10, %11 : vector<2x512xf32>
    %13 = arith.truncf %12 : vector<2x512xf32> to vector<2x512xbf16>
    %14 = vector.extract_strided_slice %13 {offsets = [0, 0], sizes = [2, 256], strides = [1, 1]} : vector<2x512xbf16> to vector<2x256xbf16>
    %c0_11 = arith.constant 0 : index
    %c0_12 = arith.constant 0 : index
    %c0_13 = arith.constant 0 : index
    %15 = vector.load %arg5[%c0_11, %c0_12, %c0_13] : memref<2x256x256xbf16, #tpu.memory_space<vmem>>, vector<1x256x256xbf16>
    %16 = vector.shape_cast %15 : vector<1x256x256xbf16> to vector<256x256xbf16>
    %cst_14 = arith.constant dense<0.000000e+00> : vector<2x256xf32>
    %17 = tpu.matmul %14, %16, %cst_14 {dimension_numbers = #tpu.dot_dimension_numbers<[1], [0], [0], [1], [0, 0, 1, 1], [], []>} : vector<2x256xbf16>, vector<256x256xbf16>, vector<2x256xf32> -> vector<2x256xf32>
    %c0_15 = arith.constant 0 : index
    %c0_16 = arith.constant 0 : index
    %c0_17 = arith.constant 0 : index
    %18 = vector.load %arg6[%c0_15, %c0_16, %c0_17] : memref<2x1x256xf32, #tpu.memory_space<vmem>>, vector<1x1x256xf32>
    %19 = vector.shape_cast %18 : vector<1x1x256xf32> to vector<1x256xf32>
    %20 = vector.broadcast %19 : vector<1x256xf32> to vector<2x256xf32>
    %21 = arith.addf %17, %20 : vector<2x256xf32>
    %cst_18 = arith.constant 0.000000e+00 : f32
    %22 = vector.broadcast %cst_18 : f32 to vector<2x256xf32>
    %23 = arith.maximumf %21, %22 : vector<2x256xf32>
    %24 = arith.truncf %23 : vector<2x256xf32> to vector<2x256xbf16>
    %c0_19 = arith.constant 0 : index
    %c0_20 = arith.constant 0 : index
    %c0_21 = arith.constant 0 : index
    %25 = vector.load %arg7[%c0_19, %c0_20, %c0_21] : memref<2x256x1xbf16, #tpu.memory_space<vmem>>, vector<1x256x1xbf16>
    %26 = vector.shape_cast %25 : vector<1x256x1xbf16> to vector<256x1xbf16>
    %cst_22 = arith.constant dense<0.000000e+00> : vector<2x1xf32>
    %27 = tpu.matmul %24, %26, %cst_22 {dimension_numbers = #tpu.dot_dimension_numbers<[1], [0], [0], [1], [0, 0, 1, 1], [], []>} : vector<2x256xbf16>, vector<256x1xbf16>, vector<2x1xf32> -> vector<2x1xf32>
    %c0_23 = arith.constant 0 : index
    %c0_24 = arith.constant 0 : index
    %c0_25 = arith.constant 0 : index
    %28 = vector.load %arg8[%c0_23, %c0_24, %c0_25] : memref<2x1x1xf32, #tpu.memory_space<vmem>>, vector<1x1x1xf32>
    %29 = vector.shape_cast %28 : vector<1x1x1xf32> to vector<1x1xf32>
    %30 = vector.broadcast %29 : vector<1x1xf32> to vector<2x1xf32>
    %31 = arith.addf %27, %30 : vector<2x1xf32>
    %c0_26 = arith.constant 0 : index
    %c0_27 = arith.constant 0 : index
    %c0_28 = arith.constant 0 : index
    %32 = vector.load %arg9[%c0_26, %c0_27, %c0_28] : memref<2x2x1xf32, #tpu.memory_space<vmem>>, vector<1x2x1xf32>
    %33 = vector.shape_cast %32 : vector<1x2x1xf32> to vector<2x1xf32>
    %34 = vector.shape_cast %31 : vector<2x1xf32> to vector<1x2x1xf32>
    tpu.vector_store %arg9[%c0_26, %c0_27, %c0_28], %34 {strides = array<i32>} : memref<2x2x1xf32, #tpu.memory_space<vmem>>, vector<1x2x1xf32>,
    %35 = vector.extract_strided_slice %13 {offsets = [0, 256], sizes = [2, 256], strides = [1, 1]} : vector<2x512xbf16> to vector<2x256xbf16>
    %c1 = arith.constant 1 : index
    %c0_29 = arith.constant 0 : index
    %c0_30 = arith.constant 0 : index
    %36 = vector.load %arg5[%c1, %c0_29, %c0_30] : memref<2x256x256xbf16, #tpu.memory_space<vmem>>, vector<1x256x256xbf16>
    %37 = vector.shape_cast %36 : vector<1x256x256xbf16> to vector<256x256xbf16>
    %cst_31 = arith.constant dense<0.000000e+00> : vector<2x256xf32>
    %38 = tpu.matmul %35, %37, %cst_31 {dimension_numbers = #tpu.dot_dimension_numbers<[1], [0], [0], [1], [0, 0, 1, 1], [], []>} : vector<2x256xbf16>, vector<256x256xbf16>, vector<2x256xf32> -> vector<2x256xf32>
    %c1_32 = arith.constant 1 : index
    %c0_33 = arith.constant 0 : index
    %c0_34 = arith.constant 0 : index
    %39 = vector.load %arg6[%c1_32, %c0_33, %c0_34] : memref<2x1x256xf32, #tpu.memory_space<vmem>>, vector<1x1x256xf32>
    %40 = vector.shape_cast %39 : vector<1x1x256xf32> to vector<1x256xf32>
    %41 = vector.broadcast %40 : vector<1x256xf32> to vector<2x256xf32>
    %42 = arith.addf %38, %41 : vector<2x256xf32>
    %cst_35 = arith.constant 0.000000e+00 : f32
    %43 = vector.broadcast %cst_35 : f32 to vector<2x256xf32>
    %44 = arith.maximumf %42, %43 : vector<2x256xf32>
    %45 = arith.truncf %44 : vector<2x256xf32> to vector<2x256xbf16>
    %c1_36 = arith.constant 1 : index
    %c0_37 = arith.constant 0 : index
    %c0_38 = arith.constant 0 : index
    %46 = vector.load %arg7[%c1_36, %c0_37, %c0_38] : memref<2x256x1xbf16, #tpu.memory_space<vmem>>, vector<1x256x1xbf16>
    %47 = vector.shape_cast %46 : vector<1x256x1xbf16> to vector<256x1xbf16>
    %cst_39 = arith.constant dense<0.000000e+00> : vector<2x1xf32>
    %48 = tpu.matmul %45, %47, %cst_39 {dimension_numbers = #tpu.dot_dimension_numbers<[1], [0], [0], [1], [0, 0, 1, 1], [], []>} : vector<2x256xbf16>, vector<256x1xbf16>, vector<2x1xf32> -> vector<2x1xf32>
    %c1_40 = arith.constant 1 : index
    %c0_41 = arith.constant 0 : index
    %c0_42 = arith.constant 0 : index
    %49 = vector.load %arg8[%c1_40, %c0_41, %c0_42] : memref<2x1x1xf32, #tpu.memory_space<vmem>>, vector<1x1x1xf32>
    %50 = vector.shape_cast %49 : vector<1x1x1xf32> to vector<1x1xf32>
    %51 = vector.broadcast %50 : vector<1x1xf32> to vector<2x1xf32>
    %52 = arith.addf %48, %51 : vector<2x1xf32>
    %c1_43 = arith.constant 1 : index
    %c0_44 = arith.constant 0 : index
    %c0_45 = arith.constant 0 : index
    %53 = vector.load %arg9[%c1_43, %c0_44, %c0_45] : memref<2x2x1xf32, #tpu.memory_space<vmem>>, vector<1x2x1xf32>
    %54 = vector.shape_cast %53 : vector<1x2x1xf32> to vector<2x1xf32>
    %55 = vector.shape_cast %52 : vector<2x1xf32> to vector<1x2x1xf32>
    tpu.vector_store %arg9[%c1_43, %c0_44, %c0_45], %55 {strides = array<i32>} : memref<2x2x1xf32, #tpu.memory_space<vmem>>, vector<1x2x1xf32>,
    return
  }
}

</mosaic_0001>

<bundles_post_ra>
// kernel: twinned_q_forward.1
= control target key start
LH: loop header
LB: loop body
LE: loop exit
PB: predicated region body
PF: predicated region fallthrough
CT: control target
= control target key end

     0   :  { %14 = vsyncpa [#allocation3], 0  ;;  %s2548_s0 = inlined_call_operand.vmem [shape: f32[2,288], index: 0, kind: input, shape index: {}]   ;;  %s2549_s1 = inlined_call_operand.vmem [shape: f32[2,4], index: 1, kind: input, shape index: {}]   ;;  %s2550_s2 = inlined_call_operand.hbm [shape: bf16[288,512], index: 2, kind: input, shape index: {}]   ;;  %s2551_s3 = inlined_call_operand.vmem [shape: f32[4,512], index: 3, kind: input, shape index: {}]   ;;  %s2552_s4 = inlined_call_operand.vmem [shape: f32[1,512], index: 4, kind: input, shape index: {}]   ;;  %s2553_s5 = inlined_call_operand.hbm [shape: bf16[2,256,256], index: 5, kind: input, shape index: {}]   ;;  %s2554_s6 = inlined_call_operand.vmem [shape: f32[2,1,256], index: 6, kind: input, shape index: {}]   ;;  %s2555_s7 = inlined_call_operand.vmem [shape: bf16[2,256,1], index: 7, kind: input, shape index: {}]   ;;  %s2556_s8 = inlined_call_operand.vmem [shape: f32[2,1,1], index: 8, kind: input, shape index: {}]   ;;  %s2557_s9 = inlined_call_operand.vmem [shape: f32[2,2,1], index: 9, kind: output, shape index: {}]  }
   0x1   :  { %15 = vsyncpa [#allocation5], 0  ;;  %s2296_s30 = smov [#allocation2]   ;;  %s2248_s13 = scalar_lea.hbm %s2550_s2, 9216 }
   0x2   :  { %s25_s10 = sshll.u32 %s2296_s30, 4  ;;  %p2249_p0 = scmp.ne.s32.totalorder %s2550_s2, %s2248_s13  ;;  %s26_s10 = int_to_ptr.vmem [resolvable:$true] %s25_s10 }
   0x3   :  { %p2252_p1 = scmp.lt.u32.totalorder %s2248_s13, %s2550_s2 }
   0x5   :  { %p2254_p2 = pnand %p2252_p1, %p2249_p0 }
   0x7   :  { %2257 = shalt.err (!%p2254_p2)
}
   0x8   :  { %s2258_s18 = scalar_lea.vmem %s26_s10, 9216  ;;  %p2263_p4 = scmp.lt.s32.totalorder %s26_s10, %s26_s10 }
   0x9   :  { %p2259_p3 = scmp.ne.s32.totalorder %s26_s10, %s2258_s18  ;;  %p2264_p5 = scmp.lt.s32.totalorder %s2258_s18, %s2258_s18 }
   0xb   :  { %p2265_p6 = por %p2264_p5, %p2263_p4 }
   0xd   :  { %p2266_p7 = pnand %p2265_p6, %p2259_p3 }
   0xf   :  { %2269 = shalt.err (!%p2266_p7)
}
  0x10   :  { %s2297_s19 = smov 256   ;;  %s2298_s20 = smov 16  }
  0x11   :  { %31 = dma.hbm_to_vmem [thread:$0]  %s2550_s2, 9216, %s26_s10, [#allocation3], %s2297_s19, %s2297_s19, %s2298_s20  }
  0x12   :  { %s2299_s23 = smov [#allocation4]   ;;  %s2270_s27 = scalar_lea.hbm %s2553_s5, 8192 }
  0x13   :  { %s41_s24 = sshll.u32 %s2299_s23, 4  ;;  %p2271_p8 = scmp.ne.s32.totalorder %s2553_s5, %s2270_s27  ;;  %s42_s24 = int_to_ptr.vmem [resolvable:$true] %s41_s24 }
  0x14   :  { %p2274_p9 = scmp.lt.u32.totalorder %s2270_s27, %s2553_s5 }
  0x16   :  { %p2276_p10 = pnand %p2274_p9, %p2271_p8 }
  0x18   :  { %2279 = shalt.err (!%p2276_p10)
}
  0x19   :  { %s2280_s12 = scalar_lea.vmem %s42_s24, 8192  ;;  %p2285_p12 = scmp.lt.s32.totalorder %s42_s24, %s42_s24 }
  0x1a   :  { %p2281_p11 = scmp.ne.s32.totalorder %s42_s24, %s2280_s12  ;;  %p2286_p13 = scmp.lt.s32.totalorder %s2280_s12, %s2280_s12 }
  0x1c   :  { %p2287_p0 = por %p2286_p13, %p2285_p12 }
  0x1e   :  { %p2288_p1 = pnand %p2287_p0, %p2281_p11 }
  0x20   :  { %2291 = shalt.err (!%p2288_p1)
}
  0x21   :  { %s2300_s2 = smov 128   ;;  %s2301_s10 = smov 8  }
  0x22   :  { %47 = dma.hbm_to_vmem [thread:$0]  %s2553_s5, 8192, %s42_s24, [#allocation5], %s2300_s2, %s2300_s2, %s2301_s10  }
  0x23   :  { %2292 = dma.done.wait [#allocation3], 9216  }
  0x24   :  { %2293 = vsyncadd [#allocation3], 4294958080 }
  0x25   :  { %2294 = dma.done.wait [#allocation5], 8192  }
  0x26   :  { %2295 = vsyncadd [#allocation5], 4294959104  ;;  %v2302_v0 = vmov 0.0   ;;  %v158_v1 = vld [vmem:[%s2551_s3] sm:$0xff]  ;;  %vm168_vm0 = vcmask 1043456   ;;  %v159_v2 = vld [vmem:[%s2551_s3 + $0x8] sm:$0xff]  ;;  %v67_v6 = vlaneseq }
  0x27   :  { %241 = vmatprep.mubr.f32.mxu0 %v2302_v0  ;;  %312 = vmatprep.mubr.f32.mxu1 %v2302_v0  ;;  %v85_v3 = vld [vmem:[%s2549_s1] sm:$0x3]  ;;  %v2303_v4 = vmov 1983009808   ;;  %v162_v7 = vcombine.high %v158_v1, %v158_v1  ;;  %v163_v8 = vcombine.high %v159_v2, %v159_v2  ;;  %vm164_vm1 = vcmask 31744  }
  0x28   :  { %v65_v5 = vunpack.c.l.s4 %v2303_v4  ;;  %v2011_v9 = vld [vmem:[#allocation2] ss:$16 sps:$4 sm:$0xff]   ;;  %v2013_v10 = vld [vmem:[#allocation2 + $0x4] ss:$16 sps:$4 sm:$0xff]   ;;  %v2392_v15 = vshrl.u32 %v67_v6, 7  ;;  %v2304_v22 = vmov 0  }
  0x29   :  { %1743 = vmatprep.subr.msk.mxu0 %vm168_vm0, %v162_v7  ;;  %1746 = vmatprep.subr.msk.mxu1 %vm168_vm0, %v163_v8  ;;  %v2014_v11 = vld [vmem:[#allocation2 + $0x200] ss:$16 sps:$4 sm:$0xff]   ;;  %v2016_v12 = vld [vmem:[#allocation2 + $0x204] ss:$16 sps:$4 sm:$0xff]   ;;  %v2028_v20 = vld [vmem:[#allocation2 + $0xc] ss:$16 sps:$4 sm:$0xff]  }
  0x2a   :  { %1744 = vmatpush1.msk.msra.mxu0 %vm168_vm0, %v158_v1  ;;  %1747 = vmatpush1.msk.msra.mxu1 %vm168_vm0, %v159_v2  ;;  %v2019_v13 = vld [vmem:[#allocation2 + $0x24] ss:$16 sps:$4 sm:$0xff]   ;;  %v66_v14 = vunpack.c.0.s8 %v65_v5  ;;  %v2017_v17 = vld [vmem:[#allocation2 + $0x20] ss:$16 sps:$4 sm:$0xff]   ;;  %v2026_v30 = vld [vmem:[#allocation2 + $0x8] ss:$16 sps:$4 sm:$0xff]  }
  0x2b   :  { %1745 = vmatmul.mubr.msk.f32.vlgmr.msra.gmra.mrb[0].mxu0 %vm164_vm1, %v85_v3  ;;  %683 = vmatprep.subr.bf16.mxu0 %v2013_v10  ;;  %v2022_v16 = vld [vmem:[#allocation2 + $0x224] ss:$16 sps:$4 sm:$0xff]   ;;  %v2020_v18 = vld [vmem:[#allocation2 + $0x220] ss:$16 sps:$4 sm:$0xff]   ;;  %vm679_vm2 = vcmask 261120   ;;  %vm1305_vm3 = vcmask 1024  }
  0x2c   :  { %724 = vmatprep.subr.bf16.mxu1 %v2016_v12  ;;  %1748 = vmatmul.mubr.msk.f32.vlgmr.msra.gmra.mrb[0].mxu1 %vm164_vm1, %v85_v3  ;;  %v2025_v19 = vld [vmem:[#allocation2 + $0x44] ss:$16 sps:$4 sm:$0xff]   ;;  %v69_v21 = vsub.s32 %v66_v14, %v2392_v15  ;;  %v2023_v26 = vld [vmem:[#allocation2 + $0x40] ss:$16 sps:$4 sm:$0xff]   ;;  %v2035_v32 = vld [vmem:[#allocation2 + $0x2c] ss:$16 sps:$4 sm:$0xff]  }
  0x2d   :  { %684 = vmatpush1.bf16.msra.mxu0 %v2011_v9  ;;  %725 = vmatpush1.bf16.msra.mxu1 %v2014_v11  ;;  %v61_v23 = vld [vmem:[%s2548_s0] sm:$0x3f]  ;;  %v2033_v36 = vld [vmem:[#allocation2 + $0x28] ss:$16 sps:$4 sm:$0xff]   ;;  %v2041_v37 = vld [vmem:[#allocation2 + $0x4c] ss:$16 sps:$4 sm:$0xff]  }
  0x2e   :  { %685 = vmatprep.subr.bf16.mxu0 %v2019_v13  ;;  %726 = vmatprep.subr.bf16.mxu1 %v2022_v16  ;;  %v63_v24 = vcombine.high %v61_v23, %v61_v23  ;;  %v2399_v25 = vrot.slane %v61_v23, %v69_v21  ;;  %v2032_v28 = vld [vmem:[#allocation2 + $0x64] ss:$16 sps:$4 sm:$0xff]   ;;  %v2030_v34 = vld [vmem:[#allocation2 + $0x60] ss:$16 sps:$4 sm:$0xff]   ;;  %v2039_v40 = vld [vmem:[#allocation2 + $0x48] ss:$16 sps:$4 sm:$0xff]  }
  0x2f   :  { %756 = vmatprep.mubr.bf16.mxu1 %v2304_v22  ;;  %v2038_v35 = vld [vmem:[#allocation2 + $0x84] ss:$16 sps:$4 sm:$0xff]   ;;  %v2036_v38 = vld [vmem:[#allocation2 + $0x80] ss:$16 sps:$4 sm:$0xff]   ;;  %v2047_v41 = vld [vmem:[#allocation2 + $0x6c] ss:$16 sps:$4 sm:$0xff]  }
  0x30   :  { %v77_v27 = vrot.slane %v63_v24, %v69_v21  ;;  %v78_v29 = vcombine.high %v2399_v25, %v2399_v25  ;;  %v2044_v39 = vld [vmem:[#allocation2 + $0xa4] ss:$16 sps:$4 sm:$0xff]   ;;  %v2042_v42 = vld [vmem:[#allocation2 + $0xa0] ss:$16 sps:$4 sm:$0xff]   ;;  %v2045_v44 = vld [vmem:[#allocation2 + $0x68] ss:$16 sps:$4 sm:$0xff]  }
  0x31   :  { %686 = vmatpush1.bf16.msra.mxu0 %v2017_v17  ;;  %727 = vmatpush1.bf16.msra.mxu1 %v2020_v18  ;;  %v2050_v43 = vld [vmem:[#allocation2 + $0xc4] ss:$16 sps:$4 sm:$0xff]   ;;  %v2053_v45 = vld [vmem:[#allocation2 + $0x8c] ss:$16 sps:$4 sm:$0xff]   ;;  %v2048_v46 = vld [vmem:[#allocation2 + $0xc0] ss:$16 sps:$4 sm:$0xff]  }
  0x32   :  { %687 = vmatprep.subr.bf16.mxu0 %v2025_v19  ;;  %765 = vmatprep.subr.bf16.mxu1 %v2028_v20  ;;  %v2403_v31 = vpack.c.bf16 %v77_v27, %v77_v27  ;;  %v83_v33 = vpack.c.bf16 %v78_v29, %v78_v29  ;;  %v2056_v47 = vld [vmem:[#allocation2 + $0xe4] ss:$16 sps:$4 sm:$0xff]   ;;  %v2051_v48 = vld [vmem:[#allocation2 + $0x88] ss:$16 sps:$4 sm:$0xff]   ;;  %v2059_v49 = vld [vmem:[#allocation2 + $0xac] ss:$16 sps:$4 sm:$0xff]  }
  0x33   :  { %v2054_v50 = vld [vmem:[#allocation2 + $0xe0] ss:$16 sps:$4 sm:$0xff]   ;;  %v2062_v51 = vld [vmem:[#allocation2 + $0x104] ss:$16 sps:$4 sm:$0xff]   ;;  %v2057_v52 = vld [vmem:[#allocation2 + $0xa8] ss:$16 sps:$4 sm:$0xff]  }
  0x34   :  { %1821 = vmatmul.mubr.msk.bf16.vlgmr.msra.gmra.mrb[4].mxu1 %vm679_vm2, %v2403_v31  ;;  %715 = vmatprep.mubr.bf16.mxu0 %v83_v33  ;;  %v2065_v53 = vld [vmem:[#allocation2 + $0xcc] ss:$16 sps:$4 sm:$0xff]   ;;  %v2060_v54 = vld [vmem:[#allocation2 + $0x100] ss:$16 sps:$4 sm:$0xff]   ;;  %v2068_v55 = vld [vmem:[#allocation2 + $0x124] ss:$16 sps:$4 sm:$0xff]  }
  0x35   :  { %688 = vmatpush1.bf16.msra.mxu0 %v2023_v26  ;;  %766 = vmatpush1.bf16.msra.mxu1 %v2026_v30  ;;  %v2063_v56 = vld [vmem:[#allocation2 + $0xc8] ss:$16 sps:$4 sm:$0xff]   ;;  %v2071_v57 = vld [vmem:[#allocation2 + $0xec] ss:$16 sps:$4 sm:$0xff]   ;;  %v2066_v58 = vld [vmem:[#allocation2 + $0x120] ss:$16 sps:$4 sm:$0xff]   ;;  %v82_v26 = vpack.c.bf16 %v2399_v25, %v2399_v25 }
  0x36   :  { %689 = vmatprep.subr.bf16.mxu0 %v2032_v28  ;;  %767 = vmatprep.subr.bf16.mxu1 %v2035_v32  ;;  %v2074_v59 = vld [vmem:[#allocation2 + $0x144] ss:$16 sps:$4 sm:$0xff]   ;;  %v2069_v60 = vld [vmem:[#allocation2 + $0xe8] ss:$16 sps:$4 sm:$0xff]   ;;  %v2077_v61 = vld [vmem:[#allocation2 + $0x10c] ss:$16 sps:$4 sm:$0xff]  }
  0x37   :  { %797 = vmatprep.mubr.bf16.mxu1 %v83_v33  ;;  %v2072_v62 = vld [vmem:[#allocation2 + $0x140] ss:$16 sps:$4 sm:$0xff]   ;;  %v2080_v63 = vld [vmem:[#allocation2 + $0x164] ss:$16 sps:$4 sm:$0xff]   ;;  %v2075_v0 = vld [vmem:[#allocation2 + $0x108] ss:$16 sps:$4 sm:$0xff]  }
  0x38   :  { %v2083_v1 = vld [vmem:[#allocation2 + $0x12c] ss:$16 sps:$4 sm:$0xff]   ;;  %v2078_v2 = vld [vmem:[#allocation2 + $0x160] ss:$16 sps:$4 sm:$0xff]   ;;  %v2081_v3 = vld [vmem:[#allocation2 + $0x128] ss:$16 sps:$4 sm:$0xff]  }
  0x39   :  { %690 = vmatpush1.bf16.msra.mxu0 %v2030_v34  ;;  %768 = vmatpush1.bf16.msra.mxu1 %v2033_v36  ;;  %v2086_v4 = vld [vmem:[#allocation2 + $0x184] ss:$16 sps:$4 sm:$0xff]   ;;  %v2084_v5 = vld [vmem:[#allocation2 + $0x180] ss:$16 sps:$4 sm:$0xff]   ;;  %v2089_v6 = vld [vmem:[#allocation2 + $0x14c] ss:$16 sps:$4 sm:$0xff]  }
  0x3a   :  { %691 = vmatprep.subr.bf16.mxu0 %v2038_v35  ;;  %769 = vmatprep.subr.bf16.mxu1 %v2041_v37  ;;  %v2092_v7 = vld [vmem:[#allocation2 + $0x1a4] ss:$16 sps:$4 sm:$0xff]   ;;  %v2087_v8 = vld [vmem:[#allocation2 + $0x148] ss:$16 sps:$4 sm:$0xff]   ;;  %v2095_v9 = vld [vmem:[#allocation2 + $0x16c] ss:$16 sps:$4 sm:$0xff]  }
  0x3b   :  { %v2090_v10 = vld [vmem:[#allocation2 + $0x1a0] ss:$16 sps:$4 sm:$0xff]   ;;  %v2098_v11 = vld [vmem:[#allocation2 + $0x1c4] ss:$16 sps:$4 sm:$0xff]   ;;  %v2093_v12 = vld [vmem:[#allocation2 + $0x168] ss:$16 sps:$4 sm:$0xff]  }
  0x3c   :  { %v2101_v13 = vld [vmem:[#allocation2 + $0x18c] ss:$16 sps:$4 sm:$0xff]   ;;  %v2096_v14 = vld [vmem:[#allocation2 + $0x1c0] ss:$16 sps:$4 sm:$0xff]   ;;  %v2104_v16 = vld [vmem:[#allocation2 + $0x1e4] ss:$16 sps:$4 sm:$0xff]  }
  0x3d   :  { %692 = vmatpush1.bf16.msra.mxu0 %v2036_v38  ;;  %770 = vmatpush1.bf16.msra.mxu1 %v2039_v40  ;;  %v2099_v17 = vld [vmem:[#allocation2 + $0x188] ss:$16 sps:$4 sm:$0xff]   ;;  %v2107_v18 = vld [vmem:[#allocation2 + $0x1ac] ss:$16 sps:$4 sm:$0xff]   ;;  %v2102_v19 = vld [vmem:[#allocation2 + $0x1e0] ss:$16 sps:$4 sm:$0xff]  }
  0x3e   :  { %693 = vmatprep.subr.bf16.mxu0 %v2044_v39  ;;  %771 = vmatprep.subr.bf16.mxu1 %v2047_v41  ;;  %v2113_v20 = vld [vmem:[#allocation2 + $0x20c] ss:$16 sps:$4 sm:$0xff]   ;;  %v2105_v21 = vld [vmem:[#allocation2 + $0x1a8] ss:$16 sps:$4 sm:$0xff]  }
  0x3f   :  { %v2110_v23 = vld [vmem:[#allocation2 + $0x1cc] ss:$16 sps:$4 sm:$0xff]   ;;  %v2111_v24 = vld [vmem:[#allocation2 + $0x208] ss:$16 sps:$4 sm:$0xff]  }
  0x40   :  { %v2119_v27 = vld [vmem:[#allocation2 + $0x22c] ss:$16 sps:$4 sm:$0xff]   ;;  %v2108_v28 = vld [vmem:[#allocation2 + $0x1c8] ss:$16 sps:$4 sm:$0xff]  }
  0x41   :  { %694 = vmatpush1.bf16.msra.mxu0 %v2042_v42  ;;  %772 = vmatpush1.bf16.msra.mxu1 %v2045_v44  ;;  %v2116_v29 = vld [vmem:[#allocation2 + $0x1ec] ss:$16 sps:$4 sm:$0xff]   ;;  %v2117_v30 = vld [vmem:[#allocation2 + $0x228] ss:$16 sps:$4 sm:$0xff]  }
  0x42   :  { %695 = vmatprep.subr.bf16.mxu0 %v2050_v43  ;;  %773 = vmatprep.subr.bf16.mxu1 %v2053_v45  ;;  %v2114_v32 = vld [vmem:[#allocation2 + $0x1e8] ss:$16 sps:$4 sm:$0xff]   ;;  %v2122_v33 = vld [vmem:[#allocation4 + $0x4] ss:$8 sps:$4 sm:$0xff]   ;;  %v2125_v34 = vld [vmem:[#allocation4 + $0x14] ss:$8 sps:$4 sm:$0xff]  }
  0x43   :  { %v2120_v25 = vld [vmem:[#allocation4] ss:$8 sps:$4 sm:$0xff]   ;;  %v2123_v35 = vld [vmem:[#allocation4 + $0x10] ss:$8 sps:$4 sm:$0xff]   ;;  %v2128_v36 = vld [vmem:[#allocation4 + $0x24] ss:$8 sps:$4 sm:$0xff]  }
  0x44   :  { %v2126_v37 = vld [vmem:[#allocation4 + $0x20] ss:$8 sps:$4 sm:$0xff]   ;;  %v2129_v38 = vld [vmem:[#allocation4 + $0x30] ss:$8 sps:$4 sm:$0xff]   ;;  %v2134_v39 = vld [vmem:[#allocation4 + $0x44] ss:$8 sps:$4 sm:$0xff]  }
  0x45   :  { %696 = vmatpush1.bf16.msra.mxu0 %v2048_v46  ;;  %774 = vmatpush1.bf16.msra.mxu1 %v2051_v48  ;;  %v2132_v40 = vld [vmem:[#allocation4 + $0x40] ss:$8 sps:$4 sm:$0xff]   ;;  %v2135_v41 = vld [vmem:[#allocation4 + $0x50] ss:$8 sps:$4 sm:$0xff]   ;;  %v2140_v42 = vld [vmem:[#allocation4 + $0x64] ss:$8 sps:$4 sm:$0xff]  }
  0x46   :  { %697 = vmatprep.subr.bf16.mxu0 %v2056_v47  ;;  %775 = vmatprep.subr.bf16.mxu1 %v2059_v49  ;;  %v2138_v43 = vld [vmem:[#allocation4 + $0x60] ss:$8 sps:$4 sm:$0xff]   ;;  %v2143_v44 = vld [vmem:[#allocation4 + $0x74] ss:$8 sps:$4 sm:$0xff]   ;;  %v2141_v45 = vld [vmem:[#allocation4 + $0x70] ss:$8 sps:$4 sm:$0xff]  }
  0x47   :  { %v2146_v46 = vld [vmem:[#allocation4 + $0x84] ss:$8 sps:$4 sm:$0xff]   ;;  %v2144_v47 = vld [vmem:[#allocation4 + $0x80] ss:$8 sps:$4 sm:$0xff]   ;;  %v2149_v48 = vld [vmem:[#allocation4 + $0x94] ss:$8 sps:$4 sm:$0xff]  }
  0x48   :  { %v2147_v49 = vld [vmem:[#allocation4 + $0x90] ss:$8 sps:$4 sm:$0xff]  }
  0x49   :  { %698 = vmatpush1.bf16.msra.mxu0 %v2054_v50  ;;  %776 = vmatpush1.bf16.msra.mxu1 %v2057_v52  ;;  %v2152_v50 = vld [vmem:[#allocation4 + $0xa4] ss:$8 sps:$4 sm:$0xff]   ;;  %v2155_v52 = vld [vmem:[#allocation4 + $0xb4] ss:$8 sps:$4 sm:$0xff]  }
  0x4a   :  { %699 = vmatprep.subr.bf16.mxu0 %v2062_v51  ;;  %777 = vmatprep.subr.bf16.mxu1 %v2065_v53  ;;  %v2150_v51 = vld [vmem:[#allocation4 + $0xa0] ss:$8 sps:$4 sm:$0xff]   ;;  %v2153_v53 = vld [vmem:[#allocation4 + $0xb0] ss:$8 sps:$4 sm:$0xff]  }
  0x4d   :  { %700 = vmatpush1.bf16.msra.mxu0 %v2060_v54  ;;  %778 = vmatpush1.bf16.msra.mxu1 %v2063_v56  ;;  %v2158_v54 = vld [vmem:[#allocation4 + $0xc4] ss:$8 sps:$4 sm:$0xff]   ;;  %v2161_v56 = vld [vmem:[#allocation4 + $0xd4] ss:$8 sps:$4 sm:$0xff]  }
  0x4e   :  { %701 = vmatprep.subr.bf16.mxu0 %v2068_v55  ;;  %779 = vmatprep.subr.bf16.mxu1 %v2071_v57  ;;  %v2156_v55 = vld [vmem:[#allocation4 + $0xc0] ss:$8 sps:$4 sm:$0xff]   ;;  %v2159_v57 = vld [vmem:[#allocation4 + $0xd0] ss:$8 sps:$4 sm:$0xff]  }
  0x51   :  { %702 = vmatpush1.bf16.msra.mxu0 %v2066_v58  ;;  %780 = vmatpush1.bf16.msra.mxu1 %v2069_v60  ;;  %v2164_v58 = vld [vmem:[#allocation4 + $0xe4] ss:$8 sps:$4 sm:$0xff]   ;;  %v2167_v60 = vld [vmem:[#allocation4 + $0xf4] ss:$8 sps:$4 sm:$0xff]  }
  0x52   :  { %703 = vmatprep.subr.bf16.mxu0 %v2074_v59  ;;  %781 = vmatprep.subr.bf16.mxu1 %v2077_v61  ;;  %v2162_v59 = vld [vmem:[#allocation4 + $0xe0] ss:$8 sps:$4 sm:$0xff]   ;;  %v2165_v61 = vld [vmem:[#allocation4 + $0xf0] ss:$8 sps:$4 sm:$0xff]  }
  0x55   :  { %704 = vmatpush1.bf16.msra.mxu0 %v2072_v62  ;;  %782 = vmatpush1.bf16.msra.mxu1 %v2075_v0  ;;  %v2168_v62 = vld [vmem:[%s2555_s7 + $0x40] sm:$0xff]   ;;  %v2170_v0 = vld [vmem:[%s2555_s7 + $0x48] sm:$0xff]  }
  0x56   :  { %705 = vmatprep.subr.bf16.mxu0 %v2080_v63  ;;  %783 = vmatprep.subr.bf16.mxu1 %v2083_v1  ;;  %v2169_v63 = vld [vmem:[%s2555_s7] sm:$0xff]   ;;  %v2171_v1 = vld [vmem:[%s2555_s7 + $0x8] sm:$0xff]  }
  0x59   :  { %706 = vmatpush1.bf16.msra.mxu0 %v2078_v2  ;;  %784 = vmatpush1.bf16.msra.mxu1 %v2081_v3  ;;  %v2172_v2 = vld [vmem:[%s2555_s7 + $0x50] sm:$0xff]  }
  0x5a   :  { %707 = vmatprep.subr.bf16.mxu0 %v2086_v4  ;;  %785 = vmatprep.subr.bf16.mxu1 %v2089_v6  ;;  %v2173_v3 = vld [vmem:[%s2555_s7 + $0x10] sm:$0xff]   ;;  %v2174_v4 = vld [vmem:[%s2555_s7 + $0x58] sm:$0xff]   ;;  %v2176_v6 = vld [vmem:[%s2555_s7 + $0x60] sm:$0xff]  }
  0x5d   :  { %708 = vmatpush1.bf16.msra.mxu0 %v2084_v5  ;;  %786 = vmatpush1.bf16.msra.mxu1 %v2087_v8  ;;  %v2175_v5 = vld [vmem:[%s2555_s7 + $0x18] sm:$0xff]   ;;  %v2178_v8 = vld [vmem:[%s2555_s7 + $0x68] sm:$0xff]  }
  0x5e   :  { %709 = vmatprep.subr.bf16.mxu0 %v2092_v7  ;;  %787 = vmatprep.subr.bf16.mxu1 %v2095_v9  ;;  %v2177_v7 = vld [vmem:[%s2555_s7 + $0x20] sm:$0xff]   ;;  %v2179_v9 = vld [vmem:[%s2555_s7 + $0x28] sm:$0xff]  }
  0x61   :  { %710 = vmatpush1.bf16.msra.mxu0 %v2090_v10  ;;  %788 = vmatpush1.bf16.msra.mxu1 %v2093_v12 }
  0x62   :  { %711 = vmatprep.subr.bf16.mxu0 %v2098_v11  ;;  %789 = vmatprep.subr.bf16.mxu1 %v2101_v13 }
  0x65   :  { %712 = vmatpush1.bf16.msra.mxu0 %v2096_v14  ;;  %790 = vmatpush1.bf16.msra.mxu1 %v2099_v17 }
  0x66   :  { %713 = vmatprep.subr.bf16.mxu0 %v2104_v16  ;;  %791 = vmatprep.subr.bf16.mxu1 %v2107_v18 }
  0x69   :  { %714 = vmatpush1.bf16.msra.mxu0 %v2102_v19  ;;  %792 = vmatpush1.bf16.msra.mxu1 %v2105_v21  ;;  %v2449_v19 = vsub.s32 0, %v2392_v15  ;;  %v2455_v21 = vsub.s32 1, %v2392_v15 }
  0x6a   :  { %806 = vmatprep.subr.bf16.mxu0 %v2113_v20  ;;  %793 = vmatprep.subr.bf16.mxu1 %v2110_v23  ;;  %v847_v20 = vld [vmem:[%s2552_s4] sm:$0xf] }
  0x6c   :  { %716 = vmatmul.mubr.bf16.vlgmr.msra.gmra.mrb[4].mxu0 %v82_v26 }
  0x6d   :  { %807 = vmatpush1.bf16.msra.mxu0 %v2111_v24  ;;  %838 = vmatprep.mubr.bf16.mxu0 %v2304_v22  ;;  %v2131_v22 = vld [vmem:[#allocation4 + $0x34] ss:$8 sps:$4 sm:$0xff]  }
  0x6e   :  { %808 = vmatprep.subr.bf16.mxu0 %v2119_v27  ;;  %794 = vmatpush1.bf16.msra.mxu1 %v2108_v28 }
  0x6f   :  { %795 = vmatprep.subr.bf16.mxu1 %v2116_v29  ;;  %v856_v29 = vrot.slane %v847_v20, %v2455_v21 }
  0x71   :  { %809 = vmatpush1.bf16.msra.mxu0 %v2117_v30 }
  0x72   :  { %796 = vmatpush1.bf16.msra.mxu1 %v2114_v32  ;;  %1085 = vmatprep.subr.bf16.mxu0 %v2122_v33 }
  0x73   :  { %1956 = vmatprep.subr.bf16.mxu1 %v2168_v62 }
  0x74   :  { %1822 = vmatmul.mubr.msk.bf16.vlgmr.msra.gmra.mrb[8].mxu0 %vm679_vm2, %v2403_v31  ;;  %v2137_v31 = vld [vmem:[#allocation4 + $0x54] ss:$8 sps:$4 sm:$0xff]  }
  0x75   :  { %798 = vmatmul.mubr.bf16.vlgmr.msra.gmra.mrb[8].mxu1 %v82_v26  ;;  %1086 = vmatpush1.bf16.msra.mxu0 %v2120_v25  ;;  %v852_v26 = vrot.slane %v847_v20, %v2449_v19 }
  0x76   :  { %1087 = vmatprep.subr.bf16.mxu0 %v2125_v34  ;;  %1957 = vmatpush3.bf16.msra.mxu1 %v2169_v63 }
  0x77   :  { %1958 = vmatprep.subr.bf16.mxu1 %v2170_v0 }
  0x79   :  { %1088 = vmatpush1.bf16.msra.mxu0 %v2123_v35 }
  0x7a   :  { %1089 = vmatprep.subr.bf16.mxu0 %v2128_v36  ;;  %1959 = vmatpush3.bf16.msra.mxu1 %v2171_v1 }
  0x7b   :  { %1960 = vmatprep.subr.bf16.mxu1 %v2172_v2 }
  0x7d   :  { %1090 = vmatpush1.bf16.msra.mxu0 %v2126_v37  ;;  %v859_v37 = vsub.s32 2, %v2392_v15 }
  0x7e   :  { %1091 = vmatprep.subr.bf16.mxu0 %v2131_v22  ;;  %1961 = vmatpush3.bf16.msra.mxu1 %v2173_v3 }
  0x7f   :  { %1962 = vmatprep.subr.bf16.mxu1 %v2174_v4 }
  0x81   :  { %1092 = vmatpush1.bf16.msra.mxu0 %v2129_v38  ;;  %v863_v38 = vsub.s32 3, %v2392_v15 }
  0x82   :  { %1093 = vmatprep.subr.bf16.mxu0 %v2134_v39  ;;  %1963 = vmatpush3.bf16.msra.mxu1 %v2175_v5 }
  0x83   :  { %1964 = vmatprep.subr.bf16.mxu1 %v2176_v6 }
  0x85   :  { %1094 = vmatpush1.bf16.msra.mxu0 %v2132_v40 }
  0x86   :  { %1095 = vmatprep.subr.bf16.mxu0 %v2137_v31  ;;  %1965 = vmatpush3.bf16.msra.mxu1 %v2177_v7 }
  0x87   :  { %1966 = vmatprep.subr.bf16.mxu1 %v2178_v8 }
  0x89   :  { %1096 = vmatpush1.bf16.msra.mxu0 %v2135_v41 }
  0x8a   :  { %1097 = vmatprep.subr.bf16.mxu0 %v2140_v42  ;;  %1967 = vmatpush3.bf16.msra.mxu1 %v2179_v9  ;;  %v2184_v9 = vld [vmem:[#allocation4 + $0x100] ss:$8 sps:$4 sm:$0xff]  }
  0x8d   :  { %1098 = vmatpush1.bf16.msra.mxu0 %v2138_v43 }
  0x8e   :  { %1099 = vmatprep.subr.bf16.mxu0 %v2143_v44 }
  0x91   :  { %1100 = vmatpush1.bf16.msra.mxu0 %v2141_v45 }
  0x92   :  { %1101 = vmatprep.subr.bf16.mxu0 %v2146_v46  ;;  %v860_v46 = vrot.slane %v847_v20, %v859_v37  ;;  %v2219_v37 = vld [vmem:[#allocation4 + $0x1b4] ss:$8 sps:$4 sm:$0xff]  }
  0x95   :  { %1102 = vmatpush1.bf16.msra.mxu0 %v2144_v47 }
  0x96   :  { %1103 = vmatprep.subr.bf16.mxu0 %v2149_v48 }
  0x99   :  { %1104 = vmatpush1.bf16.msra.mxu0 %v2147_v49  ;;  %v864_v49 = vrot.slane %v847_v20, %v863_v38  ;;  %v2198_v20 = vld [vmem:[#allocation4 + $0x144] ss:$8 sps:$4 sm:$0xff]  }
  0x9a   :  { %1105 = vmatprep.subr.bf16.mxu0 %v2152_v50  ;;  %v2222_v38 = vld [vmem:[#allocation4 + $0x1c4] ss:$8 sps:$4 sm:$0xff]  }
  0x9d   :  { %1106 = vmatpush1.bf16.msra.mxu0 %v2150_v51 }
  0x9e   :  { %1107 = vmatprep.subr.bf16.mxu0 %v2155_v52 }
  0xa1   :  { %1108 = vmatpush1.bf16.msra.mxu0 %v2153_v53 }
  0xa2   :  { %1109 = vmatprep.subr.bf16.mxu0 %v2158_v54 }
  0xa5   :  { %1110 = vmatpush1.bf16.msra.mxu0 %v2156_v55  ;;  %v2180_v55 = vld [vmem:[%s2555_s7 + $0x70] sm:$0xff]  }
  0xa6   :  { %1111 = vmatprep.subr.bf16.mxu0 %v2161_v56  ;;  %v2181_v56 = vld [vmem:[%s2555_s7 + $0x30] sm:$0xff]   ;;  %1968 = vmatprep.subr.bf16.mxu1 %v2180_v55  ;;  %v2241_v55 = vld [vmem:[%s2555_s7 + $0xa0] sm:$0xff]  }
  0xa7   :  { %1969 = vmatpush3.bf16.msra.mxu1 %v2181_v56  ;;  %v2242_v56 = vld [vmem:[%s2555_s7 + $0xe8] sm:$0xff]  }
  0xa9   :  { %1112 = vmatpush1.bf16.msra.mxu0 %v2159_v57  ;;  %v2182_v57 = vld [vmem:[%s2555_s7 + $0x78] sm:$0xff]  }
  0xaa   :  { %1113 = vmatprep.subr.bf16.mxu0 %v2164_v58  ;;  %v2183_v58 = vld [vmem:[%s2555_s7 + $0x38] sm:$0xff]   ;;  %1970 = vmatprep.subr.bf16.mxu1 %v2182_v57  ;;  %v2243_v57 = vld [vmem:[%s2555_s7 + $0xa8] sm:$0xff]  }
  0xab   :  { %1971 = vmatpush3.bf16.msra.mxu1 %v2183_v58  ;;  %v2244_v58 = vld [vmem:[%s2555_s7 + $0xf0] sm:$0xff]  }
  0xad   :  { %1114 = vmatpush1.bf16.msra.mxu0 %v2162_v59  ;;  %v2186_v59 = vld [vmem:[#allocation4 + $0x104] ss:$8 sps:$4 sm:$0xff]  }
  0xae   :  { %1115 = vmatprep.subr.bf16.mxu0 %v2167_v60  ;;  %1513 = vmatprep.subr.bf16.mxu1 %v2186_v59  ;;  %v913_v60 = vld [vmem:[%s2554_s6] sm:$0x3]  ;;  %v2245_v59 = vld [vmem:[%s2555_s7 + $0xb0] sm:$0xff]  }
  0xaf   :  { %v922_v62 = vrot.slane %v913_v60, %v2455_v21 }
  0xb1   :  { %1116 = vmatpush1.bf16.msra.mxu0 %v2165_v61  ;;  %v918_v61 = vrot.slane %v913_v60, %v2449_v19  ;;  %v2246_v60 = vld [vmem:[%s2555_s7 + $0xf8] sm:$0xff]  }
  0xfe   :  { %v243_v10 = vpop.f32.mrb[0].mxu0 }
  0xff   :  { %v245_v11 = vpop.f32.mrb[1].mxu0  ;;  %v314_v12 = vpop.f32.mrb[0].mxu1 }
 0x100   :  { %v316_v13 = vpop.f32.mrb[1].mxu1 }
 0x107   :  { %v758_v14 = vpop.f32.mrb[4].mxu1 }
 0x108   :  { %v760_v16 = vpop.f32.mrb[5].mxu1 }
 0x109   :  { %v762_v17 = vpop.f32.mrb[6].mxu1 }
 0x10a   :  { %v763_v18 = vpop.f32.mrb[7].mxu1  ;;  %v2195_v17 = vld [vmem:[#allocation4 + $0x134] ss:$8 sps:$4 sm:$0xff]  }
 0x10b   :  { %v2193_v18 = vld [vmem:[#allocation4 + $0x130] ss:$8 sps:$4 sm:$0xff]  }
 0x13f   :  { %v717_v23 = vpop.f32.mrb[4].mxu0 }
 0x140   :  { %v718_v24 = vadd.f32 %v717_v23, %v243_v10  ;;  %v719_v27 = vpop.f32.mrb[5].mxu0  ;;  %v2196_v23 = vld [vmem:[#allocation4 + $0x140] ss:$8 sps:$4 sm:$0xff]  }
 0x141   :  { %v720_v28 = vadd.f32 %v719_v27, %v245_v11  ;;  %v721_v30 = vpop.f32.mrb[6].mxu0  ;;  %v2189_v11 = vld [vmem:[#allocation4 + $0x114] ss:$8 sps:$4 sm:$0xff]   ;;  %v2204_v27 = vld [vmem:[#allocation4 + $0x164] ss:$8 sps:$4 sm:$0xff]  }
 0x142   :  { %v759_v32 = vadd.f32 %v758_v14, %v718_v24  ;;  %v722_v25 = vpop.f32.mrb[7].mxu0  ;;  %v2192_v14 = vld [vmem:[#allocation4 + $0x124] ss:$8 sps:$4 sm:$0xff]   ;;  %v2201_v24 = vld [vmem:[#allocation4 + $0x154] ss:$8 sps:$4 sm:$0xff]  }
 0x143   :  { %v761_v33 = vadd.f32 %v760_v16, %v720_v28  ;;  %v2190_v16 = vld [vmem:[#allocation4 + $0x120] ss:$8 sps:$4 sm:$0xff]   ;;  %v2205_v30 = vld [vmem:[#allocation4 + $0x170] ss:$8 sps:$4 sm:$0xff]  }
 0x144   :  { %v869_v34 = vadd.f32 %v852_v26, %v759_v32  ;;  %v2199_v26 = vld [vmem:[#allocation4 + $0x150] ss:$8 sps:$4 sm:$0xff]   ;;  %v2202_v28 = vld [vmem:[#allocation4 + $0x160] ss:$8 sps:$4 sm:$0xff]   ;;  %v2210_v32 = vld [vmem:[#allocation4 + $0x184] ss:$8 sps:$4 sm:$0xff]  }
 0x145   :  { %v870_v35 = vadd.f32 %v856_v29, %v761_v33  ;;  %v2207_v29 = vld [vmem:[#allocation4 + $0x174] ss:$8 sps:$4 sm:$0xff]   ;;  %v2208_v25 = vld [vmem:[#allocation4 + $0x180] ss:$8 sps:$4 sm:$0xff]  }
 0x146   :  { %v873_v36 = vmax.f32 %v869_v34, 0.0  ;;  %v2213_v33 = vld [vmem:[#allocation4 + $0x194] ss:$8 sps:$4 sm:$0xff]   ;;  %v2211_v34 = vld [vmem:[#allocation4 + $0x190] ss:$8 sps:$4 sm:$0xff]  }
 0x147   :  { %v840_v22 = vpop.f32.mrb[8].mxu0  ;;  %v874_v39 = vmax.f32 %v870_v35, 0.0  ;;  %v2216_v35 = vld [vmem:[#allocation4 + $0x1a4] ss:$8 sps:$4 sm:$0xff]  }
 0x148   :  { %v842_v40 = vpop.f32.mrb[9].mxu0  ;;  %v799_v31 = vpop.f32.mrb[8].mxu1  ;;  %v877_v43 = vpack.c.bf16 %v873_v36, %v873_v36  ;;  %v2214_v36 = vld [vmem:[#allocation4 + $0x1a0] ss:$8 sps:$4 sm:$0xff]  }
 0x149   :  { %v878_v41 = vpack.c.bf16 %v874_v39, %v874_v39  ;;  %v844_v42 = vpop.f32.mrb[10].mxu0  ;;  %v800_v44 = vadd.f32 %v799_v31, %v314_v12  ;;  %v801_v45 = vpop.f32.mrb[9].mxu1  ;;  %v2220_v39 = vld [vmem:[#allocation4 + $0x1c0] ss:$8 sps:$4 sm:$0xff]   ;;  %v2223_v31 = vld [vmem:[#allocation4 + $0x1d0] ss:$8 sps:$4 sm:$0xff]  }
 0x14a   :  { %v845_v47 = vpop.f32.mrb[11].mxu0  ;;  %v802_v48 = vadd.f32 %v801_v45, %v316_v13  ;;  %v803_v50 = vpop.f32.mrb[10].mxu1  ;;  %v2187_v13 = vld [vmem:[#allocation4 + $0x110] ss:$8 sps:$4 sm:$0xff]   ;;  %v2226_v42 = vld [vmem:[#allocation4 + $0x1e0] ss:$8 sps:$4 sm:$0xff]  }
 0x14b   :  { %1117 = vmatprep.mubr.bf16.mxu0 %v878_v41  ;;  %v841_v51 = vadd.f32 %v840_v22, %v800_v44  ;;  %v804_v52 = vpop.f32.mrb[11].mxu1  ;;  %v2217_v22 = vld [vmem:[#allocation4 + $0x1b0] ss:$8 sps:$4 sm:$0xff]   ;;  %v2228_v41 = vld [vmem:[#allocation4 + $0x1e4] ss:$8 sps:$4 sm:$0xff]  }
 0x14c   :  { %1118 = vmatmul.mubr.bf16.vlgmr.msra.gmra.mrb[12].mxu0 %v877_v43  ;;  %v843_v53 = vadd.f32 %v842_v40, %v802_v48  ;;  %v2225_v40 = vld [vmem:[#allocation4 + $0x1d4] ss:$8 sps:$4 sm:$0xff]   ;;  %v2229_v44 = vld [vmem:[#allocation4 + $0x1f0] ss:$8 sps:$4 sm:$0xff]   ;;  %v2232_v47 = vld [vmem:[%s2555_s7 + $0xc0] sm:$0xff]  }
 0x14d   :  { %v2461_v54 = vadd.f32 %v860_v46, %v841_v51  ;;  %v2231_v43 = vld [vmem:[#allocation4 + $0x1f4] ss:$8 sps:$4 sm:$0xff]   ;;  %v2233_v48 = vld [vmem:[%s2555_s7 + $0x80] sm:$0xff]   ;;  %1978 = vmatprep.subr.bf16.mxu0 %v2232_v47  ;;  %v2235_v50 = vld [vmem:[%s2555_s7 + $0x88] sm:$0xff]  }
 0x14e   :  { %v872_v15 = vadd.f32 %v864_v49, %v843_v53  ;;  %v2234_v49 = vld [vmem:[%s2555_s7 + $0xc8] sm:$0xff]   ;;  %1979 = vmatpush3.bf16.msra.mxu0 %v2233_v48  ;;  %v2236_v51 = vld [vmem:[%s2555_s7 + $0xd0] sm:$0xff]   ;;  %v2238_v53 = vld [vmem:[%s2555_s7 + $0xd8] sm:$0xff]  }
 0x14f   :  { %v875_v45 = vmax.f32 %v2461_v54, 0.0  ;;  %1980 = vmatprep.subr.bf16.mxu0 %v2234_v49  ;;  %v2237_v52 = vld [vmem:[%s2555_s7 + $0x90] sm:$0xff]   ;;  %v2239_v54 = vld [vmem:[%s2555_s7 + $0x98] sm:$0xff]  }
 0x150   :  { %v876_v6 = vmax.f32 %v872_v15, 0.0  ;;  %v2240_v15 = vld [vmem:[%s2555_s7 + $0xe0] sm:$0xff]  }
 0x151   :  { %v879_v46 = vpack.c.bf16 %v875_v45, %v875_v45 }
 0x152   :  { %v880_v12 = vpack.c.bf16 %v876_v6, %v876_v6  ;;  %1981 = vmatpush3.bf16.msra.mxu0 %v2235_v50 }
 0x153   :  { %1982 = vmatprep.subr.bf16.mxu0 %v2236_v51 }
 0x156   :  { %1983 = vmatpush3.bf16.msra.mxu0 %v2237_v52 }
 0x157   :  { %1984 = vmatprep.subr.bf16.mxu0 %v2238_v53 }
 0x15a   :  { %1985 = vmatpush3.bf16.msra.mxu0 %v2239_v54 }
 0x15b   :  { %1986 = vmatprep.subr.bf16.mxu0 %v2240_v15 }
 0x15e   :  { %1987 = vmatpush3.bf16.msra.mxu0 %v2241_v55 }
 0x15f   :  { %1988 = vmatprep.subr.bf16.mxu0 %v2242_v56 }
 0x162   :  { %1989 = vmatpush3.bf16.msra.mxu0 %v2243_v57 }
 0x163   :  { %1990 = vmatprep.subr.bf16.mxu0 %v2244_v58 }
 0x166   :  { %1991 = vmatpush3.bf16.msra.mxu0 %v2245_v59 }
 0x167   :  { %1992 = vmatprep.subr.bf16.mxu0 %v2246_v60 }
 0x21f   :  { %v1119_v63 = vpop.f32.mrb[12].mxu0 }
 0x220   :  { %v1120_v0 = vadd.f32 %v1119_v63, %v918_v61  ;;  %v1121_v1 = vpop.f32.mrb[13].mxu0  ;;  %v2247_v61 = vld [vmem:[%s2555_s7 + $0xb8] sm:$0xff]   ;;  %v1855_v63 = vld [vmem:[%s2556_s8] ss:$0 sm:$0xff] }
 0x221   :  { %v1122_v2 = vadd.f32 %v1121_v1, %v922_v62  ;;  %v1123_v3 = vpop.f32.mrb[14].mxu0  ;;  %1993 = vmatpush3.bf16.msra.mxu0 %v2247_v61 }
 0x222   :  { %v1126_v4 = vmax.f32 %v1120_v0, 0.0  ;;  %v1124_v5 = vpop.f32.mrb[15].mxu0 }
 0x223   :  { %v1127_v7 = vmax.f32 %v1122_v2, 0.0  ;;  %v1872_v5 = vld [vmem:[%s2554_s6 + $0x2] sm:$0x3] }
 0x224   :  { %v1128_v10 = vpack.c.bf16 %v1126_v4, %v1126_v4  ;;  %v1346_v6 = vrot.slane %v1872_v5, %v2449_v19 }
 0x225   :  { %v1129_v8 = vpack.c.bf16 %v1127_v7, %v1127_v7  ;;  %v1350_v7 = vrot.slane %v1872_v5, %v2455_v21 }
 0x227   :  { %1297 = vmatprep.mubr.bf16.mxu1 %v1129_v8 }
 0x228   :  { %1298 = vmatmul.mubr.bf16.vlgmr.msra.gmra.mrb[12].mxu1 %v1128_v10 }
 0x229   :  { %1514 = vmatpush1.bf16.msra.mxu1 %v2184_v9  ;;  %1545 = vmatprep.mubr.bf16.mxu1 %v880_v12 }
 0x22a   :  { %1515 = vmatprep.subr.bf16.mxu1 %v2189_v11 }
 0x22d   :  { %1516 = vmatpush1.bf16.msra.mxu1 %v2187_v13 }
 0x22e   :  { %1517 = vmatprep.subr.bf16.mxu1 %v2192_v14 }
 0x231   :  { %1518 = vmatpush1.bf16.msra.mxu1 %v2190_v16 }
 0x232   :  { %1519 = vmatprep.subr.bf16.mxu1 %v2195_v17 }
 0x235   :  { %1520 = vmatpush1.bf16.msra.mxu1 %v2193_v18 }
 0x236   :  { %1521 = vmatprep.subr.bf16.mxu1 %v2198_v20 }
 0x239   :  { %1522 = vmatpush1.bf16.msra.mxu1 %v2196_v23  ;;  %v1938_v23 = vld [vmem:[%s2556_s8 + $0x1] ss:$0 sm:$0xff] }
 0x23a   :  { %1523 = vmatprep.subr.bf16.mxu1 %v2201_v24 }
 0x23d   :  { %1524 = vmatpush1.bf16.msra.mxu1 %v2199_v26 }
 0x23e   :  { %1525 = vmatprep.subr.bf16.mxu1 %v2204_v27 }
 0x241   :  { %1526 = vmatpush1.bf16.msra.mxu1 %v2202_v28 }
 0x242   :  { %1527 = vmatprep.subr.bf16.mxu1 %v2207_v29 }
 0x245   :  { %1528 = vmatpush1.bf16.msra.mxu1 %v2205_v30 }
 0x246   :  { %1529 = vmatprep.subr.bf16.mxu1 %v2210_v32 }
 0x249   :  { %1530 = vmatpush1.bf16.msra.mxu1 %v2208_v25 }
 0x24a   :  { %1531 = vmatprep.subr.bf16.mxu1 %v2213_v33 }
 0x24d   :  { %1532 = vmatpush1.bf16.msra.mxu1 %v2211_v34 }
 0x24e   :  { %1533 = vmatprep.subr.bf16.mxu1 %v2216_v35 }
 0x251   :  { %1534 = vmatpush1.bf16.msra.mxu1 %v2214_v36 }
 0x252   :  { %1535 = vmatprep.subr.bf16.mxu1 %v2219_v37 }
 0x255   :  { %1536 = vmatpush1.bf16.msra.mxu1 %v2217_v22 }
 0x256   :  { %1537 = vmatprep.subr.bf16.mxu1 %v2222_v38 }
 0x259   :  { %1538 = vmatpush1.bf16.msra.mxu1 %v2220_v39 }
 0x25a   :  { %1539 = vmatprep.subr.bf16.mxu1 %v2225_v40 }
 0x25d   :  { %1540 = vmatpush1.bf16.msra.mxu1 %v2223_v31 }
 0x25e   :  { %1541 = vmatprep.subr.bf16.mxu1 %v2228_v41 }
 0x261   :  { %1542 = vmatpush1.bf16.msra.mxu1 %v2226_v42 }
 0x262   :  { %1543 = vmatprep.subr.bf16.mxu1 %v2231_v43 }
 0x265   :  { %1544 = vmatpush1.bf16.msra.mxu1 %v2229_v44 }
 0x268   :  { %1546 = vmatmul.mubr.bf16.vlgmr.msra.gmra.mrb[16].mxu1 %v879_v46 }
 0x2fb   :  { %v1972_v62 = vpop.f32.mrb[12].mxu1 }
 0x2fc   :  { %v1973_v0 = vpop.f32.mrb[13].mxu1 }
 0x2fd   :  { %v1974_v1 = vadd.f32 %v1973_v0, %v1972_v62  ;;  %v1975_v2 = vpop.f32.mrb[14].mxu1 }
 0x2fe   :  { %v1976_v3 = vpop.f32.mrb[15].mxu1 }
 0x2ff   :  { %v1300_v4 = vadd.f32 %v1974_v1, %v1855_v63 }
 0x301   :  { %1306 = vst.msk [vmem:[%s2557_s9] sm:$0x3] %vm1305_vm3, %v1300_v4 }
 0x33b   :  { %v1547_v8 = vpop.f32.mrb[16].mxu1 }
 0x33c   :  { %v1548_v9 = vadd.f32 %v1547_v8, %v1346_v6  ;;  %v1549_v10 = vpop.f32.mrb[17].mxu1 }
 0x33d   :  { %v1550_v11 = vadd.f32 %v1549_v10, %v1350_v7  ;;  %v1551_v12 = vpop.f32.mrb[18].mxu1 }
 0x33e   :  { %v1554_v13 = vmax.f32 %v1548_v9, 0.0  ;;  %v1552_v14 = vpop.f32.mrb[19].mxu1 }
 0x33f   :  { %v1555_v16 = vmax.f32 %v1550_v11, 0.0 }
 0x340   :  { %v1556_v18 = vpack.c.bf16 %v1554_v13, %v1554_v13 }
 0x341   :  { %v1557_v17 = vpack.c.bf16 %v1555_v16, %v1555_v16 }
 0x343   :  { %1727 = vmatprep.mubr.bf16.mxu0 %v1557_v17 }
 0x344   :  { %1728 = vmatmul.mubr.bf16.vlgmr.msra.gmra.mrb[16].mxu0 %v1556_v18 }
 0x417   :  { %v1994_v20 = vpop.f32.mrb[16].mxu0 }
 0x418   :  { %v1995_v19 = vpop.f32.mrb[17].mxu0 }
 0x419   :  { %v1996_v24 = vadd.f32 %v1995_v19, %v1994_v20  ;;  %v1997_v21 = vpop.f32.mrb[18].mxu0 }
 0x41a   :  { %v1998_v26 = vpop.f32.mrb[19].mxu0 }
 0x41b   :  { %v1730_v27 = vadd.f32 %v1996_v24, %v1938_v23 }
 0x41d   :  { %1955 = vst.msk [vmem:[%s2557_s9 + $0x2] sm:$0x3] %vm1305_vm3, %v1730_v27 }
 0x41e   :  { %1741 = vsyncpa [#allocation3], 1 }
 0x41f   :  { %1742 = vsyncpa [#allocation5], 1 }

</bundles_post_ra>
